<compile_context>
chip_gen: v7x
topology: tpu7x:2x2x1
jax: 0.10.0
libtpu: 0.0.40
codegen_flags: <defaults>
</compile_context>

<pallas_src>
import jax
import jax.numpy as jnp
from jax.experimental import pallas as pl
from jax.experimental.pallas import tpu as pltpu

MiB = 1024 * 1024


def _round_up(x, m):
    return ((x + m - 1) // m) * m


def _vmem_budget_bytes():
    """Per-kernel scoped-VMEM budget derived from the chip's physical VMEM.

    v7x: 64 MiB physical -> 32 MiB budget; v5e/v6e: 128 MiB -> 64 MiB budget.
    """
    try:
        cap = int(pltpu.get_tpu_info().vmem_capacity_bytes)
    except Exception:
        cap = 128 * MiB
    return max(min(cap // 2, 64 * MiB), 16 * MiB)


# ----------------------------------------------------------------------------
# Tiled matmul + bias:  out = x @ w + b   (x: (M,K), w: (K,N), b: (1,N))
# Operands cast to `compute_dtype` (bf16 for MXU rate), f32 accumulate,
# `out_dtype` store.  Ragged dims are zero-padded to tile multiples.
# ----------------------------------------------------------------------------
def _matmul_bias_single_kernel(x_ref, w_ref, b_ref, o_ref):
    # Full-K block: no reduction grid axis, no accumulator scratch.
    o_ref[...] = (jnp.dot(x_ref[...], w_ref[...],
                          preferred_element_type=jnp.float32)
                  + b_ref[...]).astype(o_ref.dtype)


def _matmul_bias_acc_kernel(x_ref, w_ref, b_ref, o_ref, acc_ref):
    k = pl.program_id(2)

    @pl.when(k == 0)
    def _():
        acc_ref[...] = jnp.zeros_like(acc_ref)

    acc_ref[...] += jnp.dot(x_ref[...], w_ref[...],
                            preferred_element_type=jnp.float32)

    @pl.when(k == pl.num_programs(2) - 1)
    def _():
        o_ref[...] = (acc_ref[...] + b_ref[...]).astype(o_ref.dtype)


def matmul_bias(x, w, b, *, out_dtype=jnp.float32, compute_dtype=jnp.bfloat16,
                tm_pref=512, tn_pref=512, tk_pref=None, vmem_limit_bytes=None):
    M, K = x.shape
    K2, N = w.shape
    assert K2 == K and b.shape == (1, N)

    tm = min(tm_pref, _round_up(M, 8))
    tn = min(tn_pref, _round_up(N, 128))
    k_full = _round_up(K, 128)
    tk = k_full if tk_pref is None else min(_round_up(tk_pref, 128), k_full)

    Mp, Np, Kp = _round_up(M, tm), _round_up(N, tn), _round_up(K, tk)

    xp = x.astype(compute_dtype)
    wp = w.astype(compute_dtype)
    bp = b.astype(jnp.float32)                       # bias added post-accumulate
    if (Mp, Kp) != (M, K):
        xp = jnp.pad(xp, ((0, Mp - M), (0, Kp - K)))
    if (Kp, Np) != (K, N):
        wp = jnp.pad(wp, ((0, Kp - K), (0, Np - N)))
    if Np != N:
        bp = jnp.pad(bp, ((0, 0), (0, Np - N)))

    nk = Kp // tk
    if nk == 1:
        out = pl.pallas_call(
            _matmul_bias_single_kernel,
            out_shape=jax.ShapeDtypeStruct((Mp, Np), out_dtype),
            grid_spec=pltpu.PrefetchScalarGridSpec(
                num_scalar_prefetch=0,
                grid=(Mp // tm, Np // tn),
                in_specs=[
                    pl.BlockSpec((tm, Kp), lambda i, j: (i, 0)),
                    pl.BlockSpec((Kp, tn), lambda i, j: (0, j)),
                    pl.BlockSpec((1, tn), lambda i, j: (0, j)),
                ],
                out_specs=pl.BlockSpec((tm, tn), lambda i, j: (i, j)),
            ),
            compiler_params=pltpu.CompilerParams(
                dimension_semantics=("parallel", "parallel"),
                vmem_limit_bytes=vmem_limit_bytes),
        )(xp, wp, bp)
    else:
        out = pl.pallas_call(
            _matmul_bias_acc_kernel,
            out_shape=jax.ShapeDtypeStruct((Mp, Np), out_dtype),
            grid_spec=pltpu.PrefetchScalarGridSpec(
                num_scalar_prefetch=0,
                grid=(Mp // tm, Np // tn, nk),
                in_specs=[
                    pl.BlockSpec((tm, tk), lambda i, j, k: (i, k)),
                    pl.BlockSpec((tk, tn), lambda i, j, k: (k, j)),
                    pl.BlockSpec((1, tn), lambda i, j, k: (0, j)),
                ],
                out_specs=pl.BlockSpec((tm, tn), lambda i, j, k: (i, j)),
                scratch_shapes=[pltpu.VMEM((tm, tn), jnp.float32)],
            ),
            compiler_params=pltpu.CompilerParams(
                dimension_semantics=("parallel", "parallel", "arbitrary"),
                vmem_limit_bytes=vmem_limit_bytes),
        )(xp, wp, bp)

    if (Mp, Np) != (M, N):
        out = out[:M, :N]
    return out


# ----------------------------------------------------------------------------
# Sequential LSTM recurrence.
# Grid: (batch-halves [parallel], time-chunks [arbitrary]).
# gx = x @ W_ih + b is precomputed; (h, c) carried in f32 VMEM scratch.
# ----------------------------------------------------------------------------
def _lstm_recurrence_kernel(gx_ref, whh_ref, h_out_ref, h_sc, c_sc):
    # gx_ref:  (Tc, Bblk, 4H)   compute_dtype, precomputed x@W_ih + (b_ih+b_hh)
    # whh_ref: (H, 4H)          compute_dtype, recurrent weight (pre-transposed)
    # h_out_ref: (Tc, Bblk, H)  hidden states for this chunk
    # h_sc, c_sc: (Bblk, H) f32 carried state
    H = h_sc.shape[-1]
    Tc = gx_ref.shape[0]

    @pl.when(pl.program_id(1) == 0)        # first time-chunk of this batch block
    def _():
        h_sc[...] = jnp.zeros_like(h_sc)
        c_sc[...] = jnp.zeros_like(c_sc)

    def step(i, carry):
        h, c = carry
        gates = gx_ref[i].astype(jnp.float32) + jnp.dot(
            h.astype(whh_ref.dtype), whh_ref[...],
            preferred_element_type=jnp.float32)
        # PyTorch LSTM gate order: [i, f, g, o]
        # TODO(synk): at production sizes pad H to a multiple of 128 so these
        #             gate slices are lane-aligned vreg views.
        i_g = jax.nn.sigmoid(gates[:, 0 * H:1 * H])
        f_g = jax.nn.sigmoid(gates[:, 1 * H:2 * H])
        g_g = jnp.tanh(gates[:, 2 * H:3 * H])
        o_g = jax.nn.sigmoid(gates[:, 3 * H:4 * H])
        c_new = f_g * c + i_g * g_g
        h_new = o_g * jnp.tanh(c_new)
        h_out_ref[i] = h_new.astype(h_out_ref.dtype)
        return (h_new, c_new)

    # Partial unroll: LLO scheduling visibility with bounded vreg pressure.
    h, c = jax.lax.fori_loop(0, Tc, step, (h_sc[...], c_sc[...]),
                             unroll=min(4, Tc))
    h_sc[...] = h
    c_sc[...] = c


def lstm_recurrence(gx_tm, w_hh, *, compute_dtype, vmem_limit_bytes):
    """gx_tm: (T, B_pad, 4H) time-major pre-activations -> h: (T, B_pad, H)."""
    T, B_pad, G = gx_tm.shape
    H = w_hh.shape[0]
    assert G == 4 * H

    # Split batch across the two v7x TensorCores when alignment allows
    # (harmless extra grid axis on single-TC v5e/v6e).
    NB = 2 if B_pad % 16 == 0 else 1
    B_blk = B_pad // NB

    # Derive the time-chunk from the VMEM budget: double-buffered gx block,
    # double-buffered h_out block, double-buffered W_hh, two f32 state scratches.
    db = jnp.dtype(compute_dtype).itemsize
    budget = max(vmem_limit_bytes - 4 * MiB, 1 * MiB)
    fixed = 2 * H * 4 * H * db + 2 * B_blk * H * 4
    per_t = 2 * B_blk * 4 * H * db + 2 * B_blk * H * db
    cap = max(1, (budget - fixed) // per_t)
    Tc = 1
    for d in range(1, T + 1):                  # largest divisor of T <= cap
        if T % d == 0 and d <= cap:
            Tc = d

    return pl.pallas_call(
        _lstm_recurrence_kernel,
        out_shape=jax.ShapeDtypeStruct((T, B_pad, H), compute_dtype),
        grid_spec=pltpu.PrefetchScalarGridSpec(
            num_scalar_prefetch=0,
            grid=(NB, T // Tc),
            in_specs=[
                pl.BlockSpec((Tc, B_blk, 4 * H), lambda bb, c: (c, bb, 0)),
                pl.BlockSpec((H, 4 * H), lambda bb, c: (0, 0)),
            ],
            out_specs=pl.BlockSpec((Tc, B_blk, H), lambda bb, c: (c, bb, 0)),
            scratch_shapes=[
                pltpu.VMEM((B_blk, H), jnp.float32),     # h state (f32)
                pltpu.VMEM((B_blk, H), jnp.float32),     # c state (f32)
            ],
        ),
        compiler_params=pltpu.CompilerParams(
            dimension_semantics=("parallel", "arbitrary"),
            vmem_limit_bytes=vmem_limit_bytes),
    )(gx_tm.astype(compute_dtype), w_hh.astype(compute_dtype))


# ----------------------------------------------------------------------------
# Full forward pass
# ----------------------------------------------------------------------------
def decoder_rnn_forward(features, captions, params, *,
                        compute_dtype=jnp.bfloat16, logits_dtype=jnp.float32):
    """features: (B, E) f32, captions: (B, L) int32 -> logits (B, L, V)."""
    emb_table = params["embedding"]          # (V, E)
    w_ih = params["w_ih"]                    # (E, 4H)  (pre-transposed)
    w_hh = params["w_hh"]                    # (H, 4H)  (pre-transposed)
    b = params["b"]                          # (1, 4H)  (= b_ih + b_hh)
    w_lin = params["w_lin"]                  # (H, V)   (pre-transposed)
    b_lin = params["b_lin"]                  # (1, V)

    B, E = features.shape
    H = w_hh.shape[0]
    V = emb_table.shape[0]
    vmem_limit = _vmem_budget_bytes()

    # glue (plain JAX): embedding gather + concat.
    # TODO(synk): the embedding gather stays in XLA (data-dependent gather; a
    #             Pallas version would need manual per-row DMA).
    embeds = jnp.take(emb_table, captions[:, :-1], axis=0)             # (B, L-1, E)
    inputs = jnp.concatenate([features[:, None, :], embeds], axis=1)   # (B, T, E)
    inputs = inputs.astype(jnp.float32)
    T = inputs.shape[1]

    # Pad batch to a multiple of 8 (sublane alignment); padded rows evolve
    # independently and are sliced off at the end.
    B_pad = _round_up(B, 8)
    if B_pad != B:
        inputs = jnp.pad(inputs, ((0, B_pad - B), (0, 0), (0, 0)))

    # Transpose the SMALL (B,T,E) tensor to time-major so gx is produced
    # time-major directly (no 4H-wide transpose between Pallas calls).
    inputs_tm = jnp.transpose(inputs, (1, 0, 2))                       # (T, B, E)

    # (1) hoisted input-to-hidden matmul: one big (T*B, E) @ (E, 4H); bf16
    #     operands, f32 accumulate, store gx in compute_dtype (halves VMEM/HBM).
    gx = matmul_bias(inputs_tm.reshape(T * B_pad, E), w_ih, b,
                     out_dtype=compute_dtype, compute_dtype=compute_dtype,
                     tk_pref=512, vmem_limit_bytes=vmem_limit)
    gx_tm = gx.reshape(T, B_pad, 4 * H)                                # (T, B, 4H)

    # (2) sequential recurrence: only h_{t-1} @ W_hh per step.
    h_tm = lstm_recurrence(gx_tm, w_hh, compute_dtype=compute_dtype,
                           vmem_limit_bytes=vmem_limit)                # (T, B, H)

    # (3) hoisted vocab projection: one big (B*T, H) @ (H, V); full-K block
    #     (no reduction axis), 512x512 tiles, lane-dense batch-first output.
    #     Only the small (T,B,H) tensor is transposed, never the logits.
    # TODO(synk): on bandwidth-limited v5e/v6e, pass logits_dtype=jnp.bfloat16
    #             if the consumer tolerates bf16 logits (halves the dominant
    #             HBM write).
    h_bf = jnp.transpose(h_tm, (1, 0, 2)).reshape(B_pad * T, H)
    logits = matmul_bias(h_bf, w_lin, b_lin,
                         out_dtype=logits_dtype, compute_dtype=compute_dtype,
                         tk_pref=None, vmem_limit_bytes=vmem_limit)
    logits = logits.reshape(B_pad, T, V)

    return logits[:B]                                                  # (B, T, V)


# ----------------------------------------------------------------------------
# Pure-JAX reference (for correctness check)
# ----------------------------------------------------------------------------
def decoder_rnn_reference(features, captions, params):
    emb_table = params["embedding"]
    w_ih, w_hh, b = params["w_ih"], params["w_hh"], params["b"]
    w_lin, b_lin = params["w_lin"], params["b_lin"]
    H = w_hh.shape[0]

    embeds = jnp.take(emb_table, captions[:, :-1], axis=0)
    inputs = jnp.concatenate([features[:, None, :], embeds], axis=1)
    B, T, _ = inputs.shape

    def step(carry, x_t):
        h, c = carry
        gates = x_t @ w_ih + h @ w_hh + b
        i = jax.nn.sigmoid(gates[:, 0 * H:1 * H])
        f = jax.nn.sigmoid(gates[:, 1 * H:2 * H])
        g = jnp.tanh(gates[:, 2 * H:3 * H])
        o = jax.nn.sigmoid(gates[:, 3 * H:4 * H])
        c = f * c + i * g
        h = o * jnp.tanh(c)
        return (h, c), h

    h0 = jnp.zeros((B, H), jnp.float32)
    c0 = jnp.zeros((B, H), jnp.float32)
    _, hs = jax.lax.scan(step, (h0, c0), jnp.transpose(inputs, (1, 0, 2)))
    out = hs @ w_lin + b_lin                                           # (T, B, V)
    return jnp.transpose(out, (1, 0, 2))


# ----------------------------------------------------------------------------
# Deterministic parameter init + small example
# ----------------------------------------------------------------------------
def init_params(key, embed_size, hidden_size, vocab_size):
    ks = jax.random.split(key, 7)
    s = 0.1
    return {
        "embedding": jax.random.normal(ks[0], (vocab_size, embed_size), jnp.float32) * s,
        # stored pre-transposed: x @ W_ih (E,4H), h @ W_hh (H,4H)
        "w_ih": jax.random.normal(ks[1], (embed_size, 4 * hidden_size), jnp.float32) * s,
        "w_hh": jax.random.normal(ks[2], (hidden_size, 4 * hidden_size), jnp.float32) * s,
        "b": (jax.random.normal(ks[3], (1, 4 * hidden_size), jnp.float32) * s
              + jax.random.normal(ks[4], (1, 4 * hidden_size), jnp.float32) * s),
        "w_lin": jax.random.normal(ks[5], (hidden_size, vocab_size), jnp.float32) * s,
        "b_lin": jax.random.normal(ks[6], (1, vocab_size), jnp.float32) * s,
    }


if __name__ == "__main__":
    B = 2            # batch
    E = 32           # embed_size
    H = 32           # hidden_size
    V = 128          # vocab_size
    L = 8            # caption length (sequence length T == L after concat)

    key = jax.random.PRNGKey(0)
    kp, kf, kc = jax.random.split(key, 3)

    params = init_params(kp, E, H, V)
    features = jax.random.normal(kf, (B, E), jnp.float32)
    captions = jax.random.randint(kc, (B, L), 0, V, dtype=jnp.int32)

    ref = decoder_rnn_reference(features, captions, params)

    # f32 compute path: tight match against the f32 reference.
    out_f32 = decoder_rnn_forward(features, captions, params,
                                  compute_dtype=jnp.float32)
    out_f32 = jax.block_until_ready(out_f32)
    assert out_f32.shape == (B, L, V)
    assert jnp.allclose(out_f32, ref, rtol=1e-3, atol=1e-3), "f32 mismatch"

    # bf16 MXU path (production default): looser tolerance vs the f32 reference.
    out_bf16 = decoder_rnn_forward(features, captions, params,
                                   compute_dtype=jnp.bfloat16)
    out_bf16 = jax.block_until_ready(out_bf16)
    assert out_bf16.shape == (B, L, V)
    assert jnp.allclose(out_bf16, ref, rtol=5e-2, atol=4e-2), "bf16 mismatch"

    # Exercise the K-tiled accumulator matmul path as well (K > one 128-tile).
    xk = jax.random.normal(jax.random.PRNGKey(1), (16, 256), jnp.float32)
    wk = jax.random.normal(jax.random.PRNGKey(2), (256, 128), jnp.float32)
    bk = jax.random.normal(jax.random.PRNGKey(3), (1, 128), jnp.float32)
    yk = matmul_bias(xk, wk, bk, out_dtype=jnp.float32,
                     compute_dtype=jnp.float32, tk_pref=128,
                     vmem_limit_bytes=32 * MiB)
    yk = jax.block_until_ready(yk)
    assert jnp.allclose(yk, xk @ wk + bk, rtol=1e-3, atol=1e-3), "acc-path mismatch"

    print("KERNEL_OK")
</pallas_src>

<mosaic_0001>
module attributes {stable_mosaic.version = 11 : i64} {
  func.func @_matmul_bias_single_kernel(%arg0: i32, %arg1: i32, %arg2: memref<64x128xf32, #tpu.memory_space<vmem>>, %arg3: memref<128x128xf32, #tpu.memory_space<vmem>>, %arg4: memref<1x128xf32, #tpu.memory_space<vmem>>, %arg5: memref<64x128xf32, #tpu.memory_space<vmem>>) attributes {dimension_semantics = [#tpu.dimension_semantics<parallel>, #tpu.dimension_semantics<parallel>], iteration_bounds = array<i64: 1, 1>, scalar_prefetch = 0 : i64, scratch_operands = 0 : i64, tpu.core_type = #tpu.core_type<tc>, window_params = [{transform_indices = @transform_0, window_bounds = array<i64: 64, 128>}, {transform_indices = @transform_1, window_bounds = array<i64: 128, 128>}, {transform_indices = @transform_2, window_bounds = array<i64: 1, 128>}, {transform_indices = @transform_3, window_bounds = array<i64: 64, 128>}]} {
    %c0 = arith.constant 0 : index
    %c0_0 = arith.constant 0 : index
    %0 = vector.load %arg2[%c0, %c0_0] : memref<64x128xf32, #tpu.memory_space<vmem>>, vector<64x128xf32>
    %c0_1 = arith.constant 0 : index
    %c0_2 = arith.constant 0 : index
    %1 = vector.load %arg3[%c0_1, %c0_2] : memref<128x128xf32, #tpu.memory_space<vmem>>, vector<128x128xf32>
    %cst = arith.constant dense<0.000000e+00> : vector<64x128xf32>
    %2 = tpu.matmul %0, %1, %cst {dimension_numbers = #tpu.dot_dimension_numbers<[1], [0], [0], [1], [0, 0, 1, 1], [], []>} : vector<64x128xf32>, vector<128x128xf32>, vector<64x128xf32> -> vector<64x128xf32>
    %c0_3 = arith.constant 0 : index
    %c0_4 = arith.constant 0 : index
    %3 = vector.load %arg4[%c0_3, %c0_4] : memref<1x128xf32, #tpu.memory_space<vmem>>, vector<1x128xf32>
    %4 = vector.broadcast %3 : vector<1x128xf32> to vector<64x128xf32>
    %5 = arith.addf %2, %4 : vector<64x128xf32>
    %c0_5 = arith.constant 0 : index
    %c0_6 = arith.constant 0 : index
    %6 = vector.load %arg5[%c0_5, %c0_6] : memref<64x128xf32, #tpu.memory_space<vmem>>, vector<64x128xf32>
    tpu.vector_store %arg5[%c0_5, %c0_6], %5 {strides = array<i32>} : memref<64x128xf32, #tpu.memory_space<vmem>>, vector<64x128xf32>,
    return
  }
  func.func @transform_0(%arg0: i32, %arg1: i32) -> (i32, i32) {
    %c0_i32 = arith.constant 0 : i32
    %c0_i32_0 = arith.constant 0 : i32
    return %arg0, %c0_i32 : i32, i32
  }
  func.func @transform_1(%arg0: i32, %arg1: i32) -> (i32, i32) {
    %c0_i32 = arith.constant 0 : i32
    %c0_i32_0 = arith.constant 0 : i32
    return %c0_i32, %arg1 : i32, i32
  }
  func.func @transform_2(%arg0: i32, %arg1: i32) -> (i32, i32) {
    %c0_i32 = arith.constant 0 : i32
    %c0_i32_0 = arith.constant 0 : i32
    return %c0_i32, %arg1 : i32, i32
  }
  func.func @transform_3(%arg0: i32, %arg1: i32) -> (i32, i32) {
    %c0_i32 = arith.constant 0 : i32
    return %arg0, %arg1 : i32, i32
  }
}

</mosaic_0001>

<bundles_post_ra>
// kernel: tpu_custom_call.1
= control target key start
LH: loop header
LB: loop body
LE: loop exit
PB: predicated region body
PF: predicated region fallthrough
CT: control target
= control target key end

     0   :  { %8 = vsyncpa [#allocation3], 0  ;;  %s523_s0 = inlined_call_operand.hbm [shape: f32[64,128], index: 0, kind: input, shape index: {}]   ;;  %s524_s1 = inlined_call_operand.hbm [shape: f32[128,128], index: 1, kind: input, shape index: {}]   ;;  %s525_s2 = inlined_call_operand.hbm [shape: f32[1,128], index: 2, kind: input, shape index: {}]   ;;  %s526_s3 = inlined_call_operand.hbm [shape: f32[64,128], index: 3, kind: output, shape index: {}]  }
   0x1   :  { %9 = vsyncpa [#allocation6], 0 }
   0x2   :  { %10 = vsyncpa [#allocation4], 0  ;;  %s433_s12 = smov [#allocation5]   ;;  %s434_s14 = smov [#allocation2]  }
   0x3   :  { %s28_s13 = sshll.u32 %s433_s12, 4  ;;  %s16_s15 = sshll.u32 %s434_s14, 4  ;;  %s29_s13 = int_to_ptr.vmem [resolvable:$true] %s28_s13  ;;  %s459_s15 = int_to_ptr.vmem [resolvable:$true] %s16_s15 }
   0x4   :  { %s339_s18 = scalar_lea.hbm %s524_s1, 2048 }
   0x5   :  { %p340_p0 = scmp.ne.s32.totalorder %s524_s1, %s339_s18  ;;  %p343_p1 = scmp.lt.u32.totalorder %s339_s18, %s524_s1 }
   0x7   :  { %p345_p2 = pnand %p343_p1, %p340_p0 }
   0x9   :  { %348 = shalt.err (!%p345_p2)
}
   0xa   :  { %s349_s23 = scalar_lea.vmem %s29_s13, 2048  ;;  %p354_p4 = scmp.lt.s32.totalorder %s29_s13, %s29_s13 }
   0xb   :  { %p350_p3 = scmp.ne.s32.totalorder %s29_s13, %s349_s23  ;;  %p355_p5 = scmp.lt.s32.totalorder %s349_s23, %s349_s23 }
   0xd   :  { %p356_p6 = por %p355_p5, %p354_p4 }
   0xf   :  { %p357_p7 = pnand %p356_p6, %p350_p3 }
  0x11   :  { %360 = shalt.err (!%p357_p7)
}
  0x12   :  { %s435_s24 = smov 128   ;;  %s436_s25 = smov 8  }
  0x13   :  { %34 = dma.hbm_to_vmem [thread:$0]  %s524_s1, 2048, %s29_s13, [#allocation6], %s435_s24, %s435_s24, %s436_s25  }
  0x14   :  { %s361_s30 = scalar_lea.hbm %s523_s0, 1024 }
  0x15   :  { %p362_p8 = scmp.ne.s32.totalorder %s523_s0, %s361_s30  ;;  %p365_p9 = scmp.lt.u32.totalorder %s361_s30, %s523_s0 }
  0x17   :  { %p367_p10 = pnand %p365_p9, %p362_p8 }
  0x19   :  { %370 = shalt.err (!%p367_p10)
}
  0x1a   :  { %s371_s8 = scalar_lea.vmem %s459_s15, 1024  ;;  %p376_p12 = scmp.lt.s32.totalorder %s459_s15, %s459_s15 }
  0x1b   :  { %p372_p11 = scmp.ne.s32.totalorder %s459_s15, %s371_s8  ;;  %p377_p13 = scmp.lt.s32.totalorder %s371_s8, %s371_s8 }
  0x1d   :  { %p378_p0 = por %p377_p13, %p376_p12 }
  0x1f   :  { %p379_p1 = pnand %p378_p0, %p372_p11 }
  0x21   :  { %382 = shalt.err (!%p379_p1)
}
  0x22   :  { %22 = dma.hbm_to_vmem [thread:$0]  %s523_s0, 1024, %s459_s15, [#allocation3], %s435_s24, %s435_s24, %s436_s25  }
  0x23   :  { %s437_s10 = smov [#allocation7]   ;;  %s383_s14 = scalar_lea.hbm %s525_s2, 16 }
  0x24   :  { %s41_s11 = sshll.u32 %s437_s10, 4  ;;  %p384_p2 = scmp.ne.s32.totalorder %s525_s2, %s383_s14  ;;  %s42_s11 = int_to_ptr.vmem [resolvable:$true] %s41_s11 }
  0x25   :  { %p387_p3 = scmp.lt.u32.totalorder %s383_s14, %s525_s2 }
  0x27   :  { %p389_p4 = pnand %p387_p3, %p384_p2 }
  0x29   :  { %392 = shalt.err (!%p389_p4)
}
  0x2a   :  { %s393_s20 = scalar_lea.vmem %s42_s11, 16  ;;  %s397_s0 = scalar_lea.vmem %s42_s11, 32 }
  0x2b   :  { %p394_p5 = scmp.ne.s32.totalorder %s42_s11, %s393_s20  ;;  %p398_p6 = scmp.lt.s32.totalorder %s42_s11, %s42_s11 }
  0x2c   :  { %p399_p7 = scmp.lt.s32.totalorder %s397_s0, %s393_s20 }
  0x2e   :  { %p400_p8 = por %p399_p7, %p398_p6 }
  0x30   :  { %p401_p9 = pnand %p400_p8, %p394_p5 }
  0x32   :  { %404 = shalt.err (!%p401_p9)
}
  0x33   :  { %44 = dma.hbm_to_vmem [thread:$0]  %s525_s2, 16, %s42_s11, [#allocation6]  }
  0x34   :  { %427 = dma.done.wait [#allocation3], 1024  }
  0x35   :  { %428 = vsyncadd [#allocation3], 4294966272 }
  0x36   :  { %429 = dma.done.wait [#allocation6], 2064  }
  0x37   :  { %430 = vsyncadd [#allocation6], 4294965232  ;;  %v62_v0 = vld [vmem:[#allocation5] sm:$0xff]  ;;  %v63_v1 = vld [vmem:[#allocation5 + $0x8] sm:$0xff]  ;;  %s438_s2 = smov [#allocation8]  }
  0x38   :  { %v64_v2 = vld [vmem:[#allocation5 + $0x10] sm:$0xff]  ;;  %v285_v3 = vpack.c.bf16 %v63_v1, %v62_v0  ;;  %v65_v4 = vld [vmem:[#allocation5 + $0x18] sm:$0xff]  ;;  %v66_v6 = vld [vmem:[#allocation5 + $0x20] sm:$0xff]  ;;  %s203_s22 = sshll.u32 %s438_s2, 4  ;;  %s204_s22 = int_to_ptr.vmem [resolvable:$true] %s203_s22 }
  0x39   :  { %v289_v5 = vpack.c.bf16 %v65_v4, %v64_v2  ;;  %v67_v7 = vld [vmem:[#allocation5 + $0x28] sm:$0xff]  ;;  %v54_v9 = vld [vmem:[#allocation2] sm:$0xff]  ;;  %v68_v11 = vld [vmem:[#allocation5 + $0x30] sm:$0xff]  ;;  %s405_s23 = scalar_lea.vmem %s204_s22, 1024  ;;  %p410_p11 = scmp.lt.s32.totalorder %s204_s22, %s204_s22 }
  0x3a   :  { %286 = vmatprep.subr.bf16.mxu0 %v285_v3  ;;  %317 = vmatprep.subr.bf16.mxu1 %v285_v3  ;;  %v293_v8 = vpack.c.bf16 %v67_v7, %v66_v6  ;;  %v58_v10 = vld [vmem:[#allocation2 + $0x20] sm:$0xff]  ;;  %v69_v12 = vld [vmem:[#allocation5 + $0x38] sm:$0xff]  ;;  %v71_v15 = vld [vmem:[#allocation5 + $0x48] sm:$0xff]  ;;  %p406_p10 = scmp.ne.s32.totalorder %s204_s22, %s405_s23  ;;  %p411_p12 = scmp.lt.s32.totalorder %s405_s23, %s405_s23 }
  0x3b   :  { %288 = vmatpush3.bf16.msra.mxu0 %v285_v3  ;;  %325 = vmatpush3.bf16.msra.mxu1 %v285_v3  ;;  %v297_v13 = vpack.c.bf16 %v69_v12, %v68_v11  ;;  %v70_v14 = vld [vmem:[#allocation5 + $0x40] sm:$0xff]  ;;  %v72_v17 = vld [vmem:[#allocation5 + $0x50] sm:$0xff]  ;;  %v73_v18 = vld [vmem:[#allocation5 + $0x58] sm:$0xff] }
  0x3c   :  { %290 = vmatprep.subr.bf16.mxu0 %v289_v5  ;;  %318 = vmatprep.subr.bf16.mxu1 %v289_v5  ;;  %v301_v16 = vpack.c.bf16 %v71_v15, %v70_v14  ;;  %v305_v19 = vpack.c.bf16 %v73_v18, %v72_v17  ;;  %v74_v20 = vld [vmem:[#allocation5 + $0x60] sm:$0xff]  ;;  %v75_v21 = vld [vmem:[#allocation5 + $0x68] sm:$0xff]  ;;  %v76_v23 = vld [vmem:[#allocation5 + $0x70] sm:$0xff]  ;;  %p412_p13 = por %p411_p12, %p410_p11 }
  0x3d   :  { %273 = vmatprep.mubr.f32.mxu0 %v54_v9  ;;  %279 = vmatprep.mubr.f32.mxu1 %v58_v10  ;;  %v309_v22 = vpack.c.bf16 %v75_v21, %v74_v20  ;;  %v77_v24 = vld [vmem:[#allocation5 + $0x78] sm:$0xff]  ;;  %v55_v26 = vld [vmem:[#allocation2 + $0x8] sm:$0xff]  ;;  %v56_v28 = vld [vmem:[#allocation2 + $0x10] sm:$0xff] }
  0x3e   :  { %v313_v25 = vpack.c.bf16 %v77_v24, %v76_v23  ;;  %v59_v27 = vld [vmem:[#allocation2 + $0x28] sm:$0xff]  ;;  %v60_v29 = vld [vmem:[#allocation2 + $0x30] sm:$0xff]  ;;  %v57_v30 = vld [vmem:[#allocation2 + $0x18] sm:$0xff]  ;;  %p413_p0 = pnand %p412_p13, %p406_p10 }
  0x3f   :  { %292 = vmatpush3.bf16.msra.mxu0 %v289_v5  ;;  %326 = vmatpush3.bf16.msra.mxu1 %v289_v5  ;;  %v61_v31 = vld [vmem:[#allocation2 + $0x38] sm:$0xff]  ;;  %v216_v32 = vld [vmem:[#allocation7] ss:$0 sm:$0xff] }
  0x40   :  { %294 = vmatprep.subr.bf16.mxu0 %v293_v8  ;;  %319 = vmatprep.subr.bf16.mxu1 %v293_v8 }
  0x43   :  { %296 = vmatpush3.bf16.msra.mxu0 %v293_v8  ;;  %327 = vmatpush3.bf16.msra.mxu1 %v293_v8 }
  0x44   :  { %298 = vmatprep.subr.bf16.mxu0 %v297_v13  ;;  %320 = vmatprep.subr.bf16.mxu1 %v297_v13 }
  0x47   :  { %300 = vmatpush3.bf16.msra.mxu0 %v297_v13  ;;  %328 = vmatpush3.bf16.msra.mxu1 %v297_v13 }
  0x48   :  { %302 = vmatprep.subr.bf16.mxu0 %v301_v16  ;;  %321 = vmatprep.subr.bf16.mxu1 %v301_v16 }
  0x4b   :  { %304 = vmatpush3.bf16.msra.mxu0 %v301_v16  ;;  %329 = vmatpush3.bf16.msra.mxu1 %v301_v16 }
  0x4c   :  { %306 = vmatprep.subr.bf16.mxu0 %v305_v19  ;;  %322 = vmatprep.subr.bf16.mxu1 %v305_v19 }
  0x4f   :  { %308 = vmatpush3.bf16.msra.mxu0 %v305_v19  ;;  %330 = vmatpush3.bf16.msra.mxu1 %v305_v19 }
  0x50   :  { %310 = vmatprep.subr.bf16.mxu0 %v309_v22  ;;  %323 = vmatprep.subr.bf16.mxu1 %v309_v22 }
  0x53   :  { %312 = vmatpush3.bf16.msra.mxu0 %v309_v22  ;;  %331 = vmatpush3.bf16.msra.mxu1 %v309_v22 }
  0x54   :  { %314 = vmatprep.subr.bf16.mxu0 %v313_v25  ;;  %324 = vmatprep.subr.bf16.mxu1 %v313_v25 }
  0x57   :  { %316 = vmatpush3.bf16.msra.mxu0 %v313_v25  ;;  %332 = vmatpush3.bf16.msra.mxu1 %v313_v25 }
  0x5a   :  { %274 = vmatmul.mubr.f32.vlgmr.msra.gmra.mrb[0].mxu0 %v55_v26  ;;  %280 = vmatmul.mubr.f32.vlgmr.msra.gmra.mrb[0].mxu1 %v59_v27 }
  0x5b   :  { %276 = vmatprep.mubr.f32.mxu0 %v56_v28  ;;  %282 = vmatprep.mubr.f32.mxu1 %v60_v29 }
  0x5e   :  { %277 = vmatmul.mubr.f32.gmra.mrb[2].mxu0 %v57_v30  ;;  %283 = vmatmul.mubr.f32.gmra.mrb[2].mxu1 %v61_v31 }
 0x12d   :  { %v275_v33 = vpop.f32.mrb[0].mxu0  ;;  %v281_v34 = vpop.f32.mrb[0].mxu1 }
 0x12e   :  { %v157_v35 = vadd.f32 %v275_v33, %v216_v32  ;;  %v177_v36 = vadd.f32 %v281_v34, %v216_v32  ;;  %v151_v37 = vpop.f32.mrb[1].mxu0  ;;  %v171_v38 = vpop.f32.mrb[1].mxu1 }
 0x12f   :  { %v152_v39 = vadd.f32 %v216_v32, %v151_v37  ;;  %v172_v40 = vadd.f32 %v216_v32, %v171_v38 }
 0x130   :  { %191 = vst [vmem:[#allocation8 + $0x8] sm:$0xff] %v157_v35  ;;  %195 = vst [vmem:[#allocation8 + $0x28] sm:$0xff] %v177_v36 }
 0x131   :  { %190 = vst [vmem:[#allocation8] sm:$0xff] %v152_v39  ;;  %194 = vst [vmem:[#allocation8 + $0x20] sm:$0xff] %v172_v40  ;;  %v278_v41 = vpop.f32.mrb[2].mxu0  ;;  %v284_v42 = vpop.f32.mrb[2].mxu1 }
 0x132   :  { %v167_v43 = vadd.f32 %v278_v41, %v216_v32  ;;  %v187_v44 = vadd.f32 %v284_v42, %v216_v32  ;;  %v161_v45 = vpop.f32.mrb[3].mxu0  ;;  %v181_v46 = vpop.f32.mrb[3].mxu1 }
 0x133   :  { %v162_v47 = vadd.f32 %v216_v32, %v161_v45  ;;  %v182_v48 = vadd.f32 %v216_v32, %v181_v46 }
 0x134   :  { %193 = vst [vmem:[#allocation8 + $0x18] sm:$0xff] %v167_v43  ;;  %197 = vst [vmem:[#allocation8 + $0x38] sm:$0xff] %v187_v44 }
 0x135   :  { %192 = vst [vmem:[#allocation8 + $0x10] sm:$0xff] %v162_v47  ;;  %196 = vst [vmem:[#allocation8 + $0x30] sm:$0xff] %v182_v48 }
 0x136   :  { %416 = shalt.err (!%p413_p0)
}
 0x137   :  { %s417_s28 = scalar_lea.hbm %s526_s3, 1024 }
 0x138   :  { %p418_p1 = scmp.ne.s32.totalorder %s526_s3, %s417_s28  ;;  %p421_p2 = scmp.lt.u32.totalorder %s417_s28, %s526_s3 }
 0x13a   :  { %p423_p3 = pnand %p421_p2, %p418_p1 }
 0x13c   :  { %426 = shalt.err (!%p423_p3)
}
 0x13d   :  { %209 = dma.vmem_to_hbm [thread:$0]  %s204_s22, 1024, %s526_s3, [#allocation4], %s435_s24, %s435_s24, %s436_s25  }
 0x13e   :  { %431 = dma.done.wait [#allocation4], 1024  }
 0x13f   :  { %432 = vsyncadd [#allocation4], 4294966272 }
 0x140   :  { %213 = vsyncpa [#allocation3], 1 }
 0x141   :  { %214 = vsyncpa [#allocation6], 1 }
 0x142   :  { %215 = vsyncpa [#allocation4], 1 }

</bundles_post_ra>
